<compile_context>
chip_gen: v7x
topology: tpu7x:2x2x1
jax: 0.10.0
libtpu: 0.0.40
codegen_flags: <defaults>
</compile_context>

<pallas_src>
import functools

import jax
import jax.numpy as jnp
from jax.experimental import pallas as pl
from jax.experimental.pallas import tpu as pltpu

LANES = 128            # lane width (last dim)
SUB = 32               # sub-tile rows kept vreg-resident per inner-loop step
MAX_BLOCK_ROWS = 4096  # 4096*128*4B = 2 MiB per input per pipeline buffer


def _round_up(a, b):
    return (a + b - 1) // b * b


def _num_tensorcores():
    """Best-effort TensorCores-per-chip query; falls back to 2 (harmless on 1-TC chips)."""
    try:
        info = pltpu.get_tpu_info()
        for name in ("num_tensorcores", "tensorcore_count", "num_cores", "core_count"):
            v = getattr(info, name, None)
            if v:
                v = int(v)
                if v > 0:
                    return min(v, 8)
    except Exception:
        pass
    return 2


def _mixed_loss_kernel(x_ref, t_ref, m_ref, out_ref, *, gamma, block_rows,
                       blocks_per_chunk, rows_total, binary_target):
    c = pl.program_id(0)          # chunk (megacore-parallel axis)
    i = pl.program_id(1)          # reduction step within the chunk

    @pl.when(i == 0)
    def _init():
        out_ref[...] = jnp.zeros_like(out_ref)

    # Logical (unclamped) block id.  Overshoot steps of an uneven chunk split read
    # the last real block (clamped index_map) but all of their rows are >= rows_total,
    # so the masked path zeroes them; the wrapper removes the exact contribution of
    # every zeroed element analytically.
    b = c * blocks_per_chunk + i
    base_row = b * block_rows                      # row counts stay well inside int32
    n_sub = block_rows // SUB

    gamma_f = float(gamma)
    is_int_gamma = (gamma_f == int(gamma_f)) and (0 <= int(gamma_f) <= 8)
    sub_iota = jax.lax.broadcasted_iota(jnp.int32, (SUB, 1), 0)

    def make_body(masked):
        def body(j, carry):
            f_acc, i_acc, s_acc, t_acc = carry
            r0 = pl.multiple_of(j * SUB, SUB)
            x = x_ref[pl.ds(r0, SUB), :].astype(jnp.float32)
            m = m_ref[pl.ds(r0, SUB), :].astype(jnp.float32)
            t = t_ref[pl.ds(r0, SUB), :].astype(jnp.float32)
            x = x * m                                            # input * mask
            if masked:
                # Row-level validity; select (not multiply) so garbage rows of the
                # ragged / overshoot block can never leak inf/nan into the sums.
                row_ok = sub_iota < (rows_total - base_row - r0)
                x = jnp.where(row_ok, x, 0.0)
                t = jnp.where(row_ok, t, 0.0)

            e = jnp.exp(-x)                                      # 1 EUP exp
            sig = 1.0 / (1.0 + e)                                # sigmoid(x)
            oms = 1.0 - sig
            # Stable BCE-with-logits: log(1+exp(-|x|)) == -log(max(sig, 1-sig))
            bce = jnp.maximum(x, 0.0) - x * t - jnp.log(jnp.maximum(sig, oms))  # 1 EUP log

            # Focal modulation exp(gamma * logsigmoid(-x*(2t-1)))
            if binary_target:
                sig_z = jnp.where(t > 0.5, oms, sig)             # exact for t in {0,1}
            else:
                z = -x * (t * 2.0 - 1.0)
                sig_z = 1.0 / (1.0 + jnp.exp(-z))                # soft-label fallback (+1 exp)
            if is_int_gamma:
                g = int(gamma_f)
                fmod = jnp.ones_like(sig_z) if g == 0 else sig_z
                for _ in range(max(g - 1, 0)):
                    fmod = fmod * sig_z                          # sig_z**g, no log/exp
            else:
                fmod = jnp.exp(jnp.log(sig_z) * gamma_f)

            def fold(v):                                         # (SUB,128) -> (8,128), pure VPU
                return jnp.sum(v.reshape(SUB // 8, 8, LANES), axis=0)

            return (f_acc + fold(fmod * bce),
                    i_acc + fold(sig * t),
                    s_acc + fold(sig),
                    t_acc + fold(t))
        return body

    zero = jnp.zeros((8, LANES), jnp.float32)
    init = (zero, zero, zero, zero)
    unroll = 2 if (n_sub % 2 == 0) else 1

    def run(masked):
        f, s_i, s_s, s_t = jax.lax.fori_loop(0, n_sub, make_body(masked), init,
                                             unroll=unroll)
        out_ref[0] += f       # focal-loss element sum
        out_ref[1] += s_i     # dice intersection
        out_ref[2] += s_s     # sum sigmoid(input*mask)
        out_ref[3] += s_t     # sum target

    fully_valid = base_row + block_rows <= rows_total

    @pl.when(fully_valid)
    def _interior():
        run(False)

    @pl.when(jnp.logical_not(fully_valid))
    def _boundary():
        run(True)


def mixed_loss(input_, target, mask, *, alpha, gamma, assume_binary_target=True):
    """Equivalent of MixedLoss(alpha, gamma)(input, target, mask).

    Set assume_binary_target=False for soft (non 0/1) labels; it adds one exp/element.
    """
    n = input_.size
    x = input_.reshape(-1)
    t = target.reshape(-1)
    m = mask.reshape(-1)

    # pad only the (<=127 element) remainder with zeros so the flats reshape to (rows, 128)
    pad = (-n) % LANES
    if pad:
        x = jnp.pad(x, (0, pad))
        t = jnp.pad(t, (0, pad))
        m = jnp.pad(m, (0, pad))
    rows = (n + pad) // LANES
    x, t, m = (a.reshape(rows, LANES) for a in (x, t, m))

    block_rows = min(MAX_BLOCK_ROWS, _round_up(rows, SUB))
    num_blocks = pl.cdiv(rows, block_rows)
    nchunks = max(1, min(_num_tensorcores(), num_blocks))
    blocks_per_chunk = pl.cdiv(num_blocks, nchunks)

    def in_map(c, i):
        # Clamp so the (at most nchunks-1) overshoot steps of an uneven split re-read
        # the last real block instead of issuing an OOB DMA; their rows are all
        # masked to zero in-kernel and corrected analytically below.
        return (jnp.minimum(c * blocks_per_chunk + i, num_blocks - 1), 0)

    in_spec = pl.BlockSpec((block_rows, LANES), in_map)
    out_spec = pl.BlockSpec((None, 4, 8, LANES), lambda c, i: (c, 0, 0, 0))

    kernel = functools.partial(
        _mixed_loss_kernel, gamma=float(gamma), block_rows=block_rows,
        blocks_per_chunk=blocks_per_chunk, rows_total=rows,
        binary_target=bool(assume_binary_target))

    elems = nchunks * blocks_per_chunk * block_rows * LANES
    bytes_in = rows * LANES * (x.dtype.itemsize + t.dtype.itemsize + m.dtype.itemsize)
    cost = pl.CostEstimate(flops=24 * elems, transcendentals=2 * elems,
                           bytes_accessed=int(bytes_in))

    partials = pl.pallas_call(
        kernel,
        out_shape=jax.ShapeDtypeStruct((nchunks, 4, 8, LANES), jnp.float32),
        grid_spec=pltpu.PrefetchScalarGridSpec(
            num_scalar_prefetch=0,
            grid=(nchunks, blocks_per_chunk),
            in_specs=[in_spec, in_spec, in_spec],
            out_specs=out_spec,
        ),
        compiler_params=pltpu.CompilerParams(
            dimension_semantics=(pltpu.PARALLEL, pltpu.ARBITRARY),
            vmem_limit_bytes=32 * 1024 * 1024),
        cost_estimate=cost,
    )(x, t, m)

    sums = jnp.sum(partials, axis=(0, 2, 3))          # tiny (4,) final reduction

    # Analytic removal of the processed-but-zero elements (remainder pad, ragged rows,
    # overshoot blocks): each contributes exactly 0.5**gamma*ln2 to the focal sum and
    # 0.5 to the sigmoid sum, 0 to intersection / target sums.
    n_zero = elems - n
    ln2 = 0.6931471805599453
    focal_sum = sums[0] - n_zero * (0.5 ** float(gamma)) * ln2
    sig_sum = sums[2] - n_zero * 0.5

    focal = focal_sum / n                              # FocalLoss .mean()
    smooth = 1.0
    dice = (2.0 * sums[1] + smooth) / (sig_sum + sums[3] + smooth)
    # final .mean() in the torch module is over a scalar -> identity
    return alpha * focal - jnp.log(dice)


def _reference(input_, target, mask, *, alpha, gamma):
    """Pure-JAX reference, mirroring the torch code line by line."""
    x = (input_ * mask).astype(jnp.float32).reshape(-1)
    t = target.astype(jnp.float32).reshape(-1)
    max_val = jnp.maximum(-x, 0.0)                     # (-input).clamp(min=0)
    loss = x - x * t + max_val + jnp.log(jnp.exp(-max_val) + jnp.exp(-x - max_val))
    invprobs = jax.nn.log_sigmoid(-x * (t * 2.0 - 1.0))
    focal = jnp.mean(jnp.exp(invprobs * gamma) * loss)
    s = jax.nn.sigmoid(x)
    dice = (2.0 * jnp.sum(s * t) + 1.0) / (jnp.sum(s) + jnp.sum(t) + 1.0)
    return alpha * focal - jnp.log(dice)


if __name__ == "__main__":
    key = jax.random.PRNGKey(0)
    k1, k2, k3 = jax.random.split(key, 3)

    N, C, H, W = 2, 4, 16, 16           # NCHW, matching the UNET tile usage
    alpha, gamma = 10.0, 2.0

    inp = jax.random.normal(k1, (N, C, H, W), dtype=jnp.float32)
    tgt = (jax.random.uniform(k2, (N, C, H, W)) > 0.5).astype(jnp.float32)
    msk = (jax.random.uniform(k3, (N, C, H, W)) > 0.3).astype(jnp.float32)

    out = jax.block_until_ready(mixed_loss(inp, tgt, msk, alpha=alpha, gamma=gamma))
    ref = _reference(inp, tgt, msk, alpha=alpha, gamma=gamma)
    assert jnp.allclose(out, ref, rtol=1e-5, atol=1e-5), (out, ref)

    print("KERNEL_OK")
</pallas_src>

<mosaic_0001>
module attributes {stable_mosaic.version = 11 : i64} {
  func.func @_mixed_loss_kernel(%arg0: i32, %arg1: i32, %arg2: memref<32x128xf32, #tpu.memory_space<vmem>>, %arg3: memref<32x128xf32, #tpu.memory_space<vmem>>, %arg4: memref<32x128xf32, #tpu.memory_space<vmem>>, %arg5: memref<1x4x8x128xf32, #tpu.memory_space<vmem>>) attributes {dimension_semantics = [#tpu.dimension_semantics<parallel>, #tpu.dimension_semantics<arbitrary>], iteration_bounds = array<i64: 1, 1>, scalar_prefetch = 0 : i64, scratch_operands = 0 : i64, tpu.core_type = #tpu.core_type<tc>, window_params = [{transform_indices = @transform_0, window_bounds = array<i64: 32, 128>}, {transform_indices = @transform_1, window_bounds = array<i64: 32, 128>}, {transform_indices = @transform_2, window_bounds = array<i64: 32, 128>}, {transform_indices = @transform_3, window_bounds = array<i64: 1, 4, 8, 128>}]} {
    %c0_i32 = arith.constant 0 : i32
    %0 = arith.cmpi eq, %arg1, %c0_i32 : i32
    %1 = arith.extui %0 : i1 to i32
    %c0_i32_0 = arith.constant 0 : i32
    %2 = arith.cmpi ne, %1, %c0_i32_0 : i32
    scf.if %2 {
      %cst_4 = arith.constant 0.000000e+00 : f32
      %15 = vector.broadcast %cst_4 : f32 to vector<4x8x128xf32>
      %c0 = arith.constant 0 : index
      %c0_5 = arith.constant 0 : index
      %c0_6 = arith.constant 0 : index
      %c0_7 = arith.constant 0 : index
      %16 = vector.load %arg5[%c0, %c0_5, %c0_6, %c0_7] : memref<1x4x8x128xf32, #tpu.memory_space<vmem>>, vector<1x4x8x128xf32>
      %17 = vector.shape_cast %16 : vector<1x4x8x128xf32> to vector<4x8x128xf32>
      %18 = vector.shape_cast %15 : vector<4x8x128xf32> to vector<1x4x8x128xf32>
      tpu.vector_store %arg5[%c0, %c0_5, %c0_6, %c0_7], %18 {strides = array<i32>} : memref<1x4x8x128xf32, #tpu.memory_space<vmem>>, vector<1x4x8x128xf32>,
    } else {
    }
    %c1_i32 = arith.constant 1 : i32
    %3 = arith.muli %arg0, %c1_i32 : i32
    %4 = arith.addi %3, %arg1 : i32
    %c32_i32 = arith.constant 32 : i32
    %5 = arith.muli %4, %c32_i32 : i32
    %6 = tpu.iota {dimensions = array<i32: 0>} : vector<32x1xi32>
    %cst = arith.constant 0.000000e+00 : f32
    %7 = vector.broadcast %cst : f32 to vector<8x128xf32>
    %c32_i32_1 = arith.constant 32 : i32
    %8 = arith.addi %5, %c32_i32_1 : i32
    %c16_i32 = arith.constant 16 : i32
    %9 = arith.cmpi sle, %8, %c16_i32 : i32
    %10 = arith.extui %9 : i1 to i32
    %c0_i32_2 = arith.constant 0 : i32
    %11 = arith.cmpi ne, %10, %c0_i32_2 : i32
    scf.if %11 {
      %c0_i32_4 = arith.constant 0 : i32
      %c32_i32_5 = arith.constant 32 : i32
      %15 = arith.muli %c0_i32_4, %c32_i32_5 : i32
      %16 = tpu.assume_multiple %15, 32 : i32
      %17 = arith.index_cast %16 : i32 to index
      %c0 = arith.constant 0 : index
      %18 = vector.load %arg2[%17, %c0] : memref<32x128xf32, #tpu.memory_space<vmem>>, vector<32x128xf32>
      %19 = arith.index_cast %16 : i32 to index
      %c0_6 = arith.constant 0 : index
      %20 = vector.load %arg4[%19, %c0_6] : memref<32x128xf32, #tpu.memory_space<vmem>>, vector<32x128xf32>
      %21 = arith.index_cast %16 : i32 to index
      %c0_7 = arith.constant 0 : index
      %22 = vector.load %arg3[%21, %c0_7] : memref<32x128xf32, #tpu.memory_space<vmem>>, vector<32x128xf32>
      %23 = arith.mulf %18, %20 : vector<32x128xf32>
      %cst_8 = arith.constant 0.000000e+00 : f32
      %24 = vector.broadcast %cst_8 : f32 to vector<32x128xf32>
      %25 = arith.subf %24, %23 : vector<32x128xf32>
      %26 = math.exp %25 : vector<32x128xf32>
      %cst_9 = arith.constant 1.000000e+00 : f32
      %27 = vector.broadcast %cst_9 : f32 to vector<32x128xf32>
      %28 = arith.addf %27, %26 : vector<32x128xf32>
      %cst_10 = arith.constant 1.000000e+00 : f32
      %29 = vector.broadcast %cst_10 : f32 to vector<32x128xf32>
      %30 = arith.divf %29, %28 : vector<32x128xf32>
      %cst_11 = arith.constant 1.000000e+00 : f32
      %31 = vector.broadcast %cst_11 : f32 to vector<32x128xf32>
      %32 = arith.subf %31, %30 : vector<32x128xf32>
      %cst_12 = arith.constant 0.000000e+00 : f32
      %33 = vector.broadcast %cst_12 : f32 to vector<32x128xf32>
      %34 = arith.maximumf %23, %33 : vector<32x128xf32>
      %35 = arith.mulf %23, %22 : vector<32x128xf32>
      %36 = arith.subf %34, %35 : vector<32x128xf32>
      %37 = arith.maximumf %30, %32 : vector<32x128xf32>
      %38 = math.log %37 : vector<32x128xf32>
      %39 = arith.subf %36, %38 : vector<32x128xf32>
      %cst_13 = arith.constant 5.000000e-01 : f32
      %40 = vector.broadcast %cst_13 : f32 to vector<32x128xf32>
      %41 = arith.cmpf ogt, %22, %40 : vector<32x128xf32>
      %42 = arith.select %41, %32, %30 : vector<32x128xi1>, vector<32x128xf32>
      %43 = arith.mulf %42, %42 : vector<32x128xf32>
      %44 = arith.mulf %43, %39 : vector<32x128xf32>
      %45 = vector.shape_cast %44 : vector<32x128xf32> to vector<4x8x128xf32>
      %cst_14 = arith.constant dense<0.000000e+00> : vector<8x128xf32>
      %46 = vector.multi_reduction <add>, %45, %cst_14 [0] : vector<4x8x128xf32> to vector<8x128xf32>
      %47 = arith.addf %7, %46 : vector<8x128xf32>
      %48 = arith.mulf %30, %22 : vector<32x128xf32>
      %49 = vector.shape_cast %48 : vector<32x128xf32> to vector<4x8x128xf32>
      %cst_15 = arith.constant dense<0.000000e+00> : vector<8x128xf32>
      %50 = vector.multi_reduction <add>, %49, %cst_15 [0] : vector<4x8x128xf32> to vector<8x128xf32>
      %51 = arith.addf %7, %50 : vector<8x128xf32>
      %52 = vector.shape_cast %30 : vector<32x128xf32> to vector<4x8x128xf32>
      %cst_16 = arith.constant dense<0.000000e+00> : vector<8x128xf32>
      %53 = vector.multi_reduction <add>, %52, %cst_16 [0] : vector<4x8x128xf32> to vector<8x128xf32>
      %54 = arith.addf %7, %53 : vector<8x128xf32>
      %55 = vector.shape_cast %22 : vector<32x128xf32> to vector<4x8x128xf32>
      %cst_17 = arith.constant dense<0.000000e+00> : vector<8x128xf32>
      %56 = vector.multi_reduction <add>, %55, %cst_17 [0] : vector<4x8x128xf32> to vector<8x128xf32>
      %57 = arith.addf %7, %56 : vector<8x128xf32>
      %c1_i32_18 = arith.constant 1 : i32
      %c0_19 = arith.constant 0 : index
      %c0_20 = arith.constant 0 : index
      %c0_21 = arith.constant 0 : index
      %c0_22 = arith.constant 0 : index
      %58 = vector.load %arg5[%c0_19, %c0_20, %c0_21, %c0_22] : memref<1x4x8x128xf32, #tpu.memory_space<vmem>>, vector<1x1x8x128xf32>
      %59 = vector.shape_cast %58 : vector<1x1x8x128xf32> to vector<8x128xf32>
      %60 = arith.addf %59, %47 : vector<8x128xf32>
      %c0_23 = arith.constant 0 : index
      %c0_24 = arith.constant 0 : index
      %c0_25 = arith.constant 0 : index
      %c0_26 = arith.constant 0 : index
      %61 = vector.load %arg5[%c0_23, %c0_24, %c0_25, %c0_26] : memref<1x4x8x128xf32, #tpu.memory_space<vmem>>, vector<1x1x8x128xf32>
      %62 = vector.shape_cast %61 : vector<1x1x8x128xf32> to vector<8x128xf32>
      %63 = vector.shape_cast %60 : vector<8x128xf32> to vector<1x1x8x128xf32>
      tpu.vector_store %arg5[%c0_23, %c0_24, %c0_25, %c0_26], %63 {strides = array<i32>} : memref<1x4x8x128xf32, #tpu.memory_space<vmem>>, vector<1x1x8x128xf32>,
      %c0_27 = arith.constant 0 : index
      %c1 = arith.constant 1 : index
      %c0_28 = arith.constant 0 : index
      %c0_29 = arith.constant 0 : index
      %64 = vector.load %arg5[%c0_27, %c1, %c0_28, %c0_29] : memref<1x4x8x128xf32, #tpu.memory_space<vmem>>, vector<1x1x8x128xf32>
      %65 = vector.shape_cast %64 : vector<1x1x8x128xf32> to vector<8x128xf32>
      %66 = arith.addf %65, %51 : vector<8x128xf32>
      %c0_30 = arith.constant 0 : index
      %c1_31 = arith.constant 1 : index
      %c0_32 = arith.constant 0 : index
      %c0_33 = arith.constant 0 : index
      %67 = vector.load %arg5[%c0_30, %c1_31, %c0_32, %c0_33] : memref<1x4x8x128xf32, #tpu.memory_space<vmem>>, vector<1x1x8x128xf32>
      %68 = vector.shape_cast %67 : vector<1x1x8x128xf32> to vector<8x128xf32>
      %69 = vector.shape_cast %66 : vector<8x128xf32> to vector<1x1x8x128xf32>
      tpu.vector_store %arg5[%c0_30, %c1_31, %c0_32, %c0_33], %69 {strides = array<i32>} : memref<1x4x8x128xf32, #tpu.memory_space<vmem>>, vector<1x1x8x128xf32>,
      %c0_34 = arith.constant 0 : index
      %c2 = arith.constant 2 : index
      %c0_35 = arith.constant 0 : index
      %c0_36 = arith.constant 0 : index
      %70 = vector.load %arg5[%c0_34, %c2, %c0_35, %c0_36] : memref<1x4x8x128xf32, #tpu.memory_space<vmem>>, vector<1x1x8x128xf32>
      %71 = vector.shape_cast %70 : vector<1x1x8x128xf32> to vector<8x128xf32>
      %72 = arith.addf %71, %54 : vector<8x128xf32>
      %c0_37 = arith.constant 0 : index
      %c2_38 = arith.constant 2 : index
      %c0_39 = arith.constant 0 : index
      %c0_40 = arith.constant 0 : index
      %73 = vector.load %arg5[%c0_37, %c2_38, %c0_39, %c0_40] : memref<1x4x8x128xf32, #tpu.memory_space<vmem>>, vector<1x1x8x128xf32>
      %74 = vector.shape_cast %73 : vector<1x1x8x128xf32> to vector<8x128xf32>
      %75 = vector.shape_cast %72 : vector<8x128xf32> to vector<1x1x8x128xf32>
      tpu.vector_store %arg5[%c0_37, %c2_38, %c0_39, %c0_40], %75 {strides = array<i32>} : memref<1x4x8x128xf32, #tpu.memory_space<vmem>>, vector<1x1x8x128xf32>,
      %c0_41 = arith.constant 0 : index
      %c3 = arith.constant 3 : index
      %c0_42 = arith.constant 0 : index
      %c0_43 = arith.constant 0 : index
      %76 = vector.load %arg5[%c0_41, %c3, %c0_42, %c0_43] : memref<1x4x8x128xf32, #tpu.memory_space<vmem>>, vector<1x1x8x128xf32>
      %77 = vector.shape_cast %76 : vector<1x1x8x128xf32> to vector<8x128xf32>
      %78 = arith.addf %77, %57 : vector<8x128xf32>
      %c0_44 = arith.constant 0 : index
      %c3_45 = arith.constant 3 : index
      %c0_46 = arith.constant 0 : index
      %c0_47 = arith.constant 0 : index
      %79 = vector.load %arg5[%c0_44, %c3_45, %c0_46, %c0_47] : memref<1x4x8x128xf32, #tpu.memory_space<vmem>>, vector<1x1x8x128xf32>
      %80 = vector.shape_cast %79 : vector<1x1x8x128xf32> to vector<8x128xf32>
      %81 = vector.shape_cast %78 : vector<8x128xf32> to vector<1x1x8x128xf32>
      tpu.vector_store %arg5[%c0_44, %c3_45, %c0_46, %c0_47], %81 {strides = array<i32>} : memref<1x4x8x128xf32, #tpu.memory_space<vmem>>, vector<1x1x8x128xf32>,
    } else {
    }
    %true = arith.constant true
    %12 = arith.xori %9, %true : i1
    %13 = arith.extui %12 : i1 to i32
    %c0_i32_3 = arith.constant 0 : i32
    %14 = arith.cmpi ne, %13, %c0_i32_3 : i32
    scf.if %14 {
      %c0_i32_4 = arith.constant 0 : i32
      %c32_i32_5 = arith.constant 32 : i32
      %15 = arith.muli %c0_i32_4, %c32_i32_5 : i32
      %16 = tpu.assume_multiple %15, 32 : i32
      %17 = arith.index_cast %16 : i32 to index
      %c0 = arith.constant 0 : index
      %18 = vector.load %arg2[%17, %c0] : memref<32x128xf32, #tpu.memory_space<vmem>>, vector<32x128xf32>
      %19 = arith.index_cast %16 : i32 to index
      %c0_6 = arith.constant 0 : index
      %20 = vector.load %arg4[%19, %c0_6] : memref<32x128xf32, #tpu.memory_space<vmem>>, vector<32x128xf32>
      %21 = arith.index_cast %16 : i32 to index
      %c0_7 = arith.constant 0 : index
      %22 = vector.load %arg3[%21, %c0_7] : memref<32x128xf32, #tpu.memory_space<vmem>>, vector<32x128xf32>
      %23 = arith.mulf %18, %20 : vector<32x128xf32>
      %c16_i32_8 = arith.constant 16 : i32
      %24 = arith.subi %c16_i32_8, %5 : i32
      %25 = arith.subi %24, %16 : i32
      %26 = vector.broadcast %25 : i32 to vector<32x1xi32>
      %27 = arith.cmpi slt, %6, %26 : vector<32x1xi32>
      %cst_9 = arith.constant 0.000000e+00 : f32
      %28 = vector.shape_cast %27 : vector<32x1xi1> to vector<32x1xi1>
      %29 = vector.broadcast %28 : vector<32x1xi1> to vector<32x128xi1>
      %30 = vector.broadcast %cst_9 : f32 to vector<32x128xf32>
      %31 = arith.select %29, %23, %30 : vector<32x128xi1>, vector<32x128xf32>
      %cst_10 = arith.constant 0.000000e+00 : f32
      %32 = vector.shape_cast %27 : vector<32x1xi1> to vector<32x1xi1>
      %33 = vector.broadcast %32 : vector<32x1xi1> to vector<32x128xi1>
      %34 = vector.broadcast %cst_10 : f32 to vector<32x128xf32>
      %35 = arith.select %33, %22, %34 : vector<32x128xi1>, vector<32x128xf32>
      %cst_11 = arith.constant 0.000000e+00 : f32
      %36 = vector.broadcast %cst_11 : f32 to vector<32x128xf32>
      %37 = arith.subf %36, %31 : vector<32x128xf32>
      %38 = math.exp %37 : vector<32x128xf32>
      %cst_12 = arith.constant 1.000000e+00 : f32
      %39 = vector.broadcast %cst_12 : f32 to vector<32x128xf32>
      %40 = arith.addf %39, %38 : vector<32x128xf32>
      %cst_13 = arith.constant 1.000000e+00 : f32
      %41 = vector.broadcast %cst_13 : f32 to vector<32x128xf32>
      %42 = arith.divf %41, %40 : vector<32x128xf32>
      %cst_14 = arith.constant 1.000000e+00 : f32
      %43 = vector.broadcast %cst_14 : f32 to vector<32x128xf32>
      %44 = arith.subf %43, %42 : vector<32x128xf32>
      %cst_15 = arith.constant 0.000000e+00 : f32
      %45 = vector.broadcast %cst_15 : f32 to vector<32x128xf32>
      %46 = arith.maximumf %31, %45 : vector<32x128xf32>
      %47 = arith.mulf %31, %35 : vector<32x128xf32>
      %48 = arith.subf %46, %47 : vector<32x128xf32>
      %49 = arith.maximumf %42, %44 : vector<32x128xf32>
      %50 = math.log %49 : vector<32x128xf32>
      %51 = arith.subf %48, %50 : vector<32x128xf32>
      %cst_16 = arith.constant 5.000000e-01 : f32
      %52 = vector.broadcast %cst_16 : f32 to vector<32x128xf32>
      %53 = arith.cmpf ogt, %35, %52 : vector<32x128xf32>
      %54 = arith.select %53, %44, %42 : vector<32x128xi1>, vector<32x128xf32>
      %55 = arith.mulf %54, %54 : vector<32x128xf32>
      %56 = arith.mulf %55, %51 : vector<32x128xf32>
      %57 = vector.shape_cast %56 : vector<32x128xf32> to vector<4x8x128xf32>
      %cst_17 = arith.constant dense<0.000000e+00> : vector<8x128xf32>
      %58 = vector.multi_reduction <add>, %57, %cst_17 [0] : vector<4x8x128xf32> to vector<8x128xf32>
      %59 = arith.addf %7, %58 : vector<8x128xf32>
      %60 = arith.mulf %42, %35 : vector<32x128xf32>
      %61 = vector.shape_cast %60 : vector<32x128xf32> to vector<4x8x128xf32>
      %cst_18 = arith.constant dense<0.000000e+00> : vector<8x128xf32>
      %62 = vector.multi_reduction <add>, %61, %cst_18 [0] : vector<4x8x128xf32> to vector<8x128xf32>
      %63 = arith.addf %7, %62 : vector<8x128xf32>
      %64 = vector.shape_cast %42 : vector<32x128xf32> to vector<4x8x128xf32>
      %cst_19 = arith.constant dense<0.000000e+00> : vector<8x128xf32>
      %65 = vector.multi_reduction <add>, %64, %cst_19 [0] : vector<4x8x128xf32> to vector<8x128xf32>
      %66 = arith.addf %7, %65 : vector<8x128xf32>
      %67 = vector.shape_cast %35 : vector<32x128xf32> to vector<4x8x128xf32>
      %cst_20 = arith.constant dense<0.000000e+00> : vector<8x128xf32>
      %68 = vector.multi_reduction <add>, %67, %cst_20 [0] : vector<4x8x128xf32> to vector<8x128xf32>
      %69 = arith.addf %7, %68 : vector<8x128xf32>
      %c1_i32_21 = arith.constant 1 : i32
      %c0_22 = arith.constant 0 : index
      %c0_23 = arith.constant 0 : index
      %c0_24 = arith.constant 0 : index
      %c0_25 = arith.constant 0 : index
      %70 = vector.load %arg5[%c0_22, %c0_23, %c0_24, %c0_25] : memref<1x4x8x128xf32, #tpu.memory_space<vmem>>, vector<1x1x8x128xf32>
      %71 = vector.shape_cast %70 : vector<1x1x8x128xf32> to vector<8x128xf32>
      %72 = arith.addf %71, %59 : vector<8x128xf32>
      %c0_26 = arith.constant 0 : index
      %c0_27 = arith.constant 0 : index
      %c0_28 = arith.constant 0 : index
      %c0_29 = arith.constant 0 : index
      %73 = vector.load %arg5[%c0_26, %c0_27, %c0_28, %c0_29] : memref<1x4x8x128xf32, #tpu.memory_space<vmem>>, vector<1x1x8x128xf32>
      %74 = vector.shape_cast %73 : vector<1x1x8x128xf32> to vector<8x128xf32>
      %75 = vector.shape_cast %72 : vector<8x128xf32> to vector<1x1x8x128xf32>
      tpu.vector_store %arg5[%c0_26, %c0_27, %c0_28, %c0_29], %75 {strides = array<i32>} : memref<1x4x8x128xf32, #tpu.memory_space<vmem>>, vector<1x1x8x128xf32>,
      %c0_30 = arith.constant 0 : index
      %c1 = arith.constant 1 : index
      %c0_31 = arith.constant 0 : index
      %c0_32 = arith.constant 0 : index
      %76 = vector.load %arg5[%c0_30, %c1, %c0_31, %c0_32] : memref<1x4x8x128xf32, #tpu.memory_space<vmem>>, vector<1x1x8x128xf32>
      %77 = vector.shape_cast %76 : vector<1x1x8x128xf32> to vector<8x128xf32>
      %78 = arith.addf %77, %63 : vector<8x128xf32>
      %c0_33 = arith.constant 0 : index
      %c1_34 = arith.constant 1 : index
      %c0_35 = arith.constant 0 : index
      %c0_36 = arith.constant 0 : index
      %79 = vector.load %arg5[%c0_33, %c1_34, %c0_35, %c0_36] : memref<1x4x8x128xf32, #tpu.memory_space<vmem>>, vector<1x1x8x128xf32>
      %80 = vector.shape_cast %79 : vector<1x1x8x128xf32> to vector<8x128xf32>
      %81 = vector.shape_cast %78 : vector<8x128xf32> to vector<1x1x8x128xf32>
      tpu.vector_store %arg5[%c0_33, %c1_34, %c0_35, %c0_36], %81 {strides = array<i32>} : memref<1x4x8x128xf32, #tpu.memory_space<vmem>>, vector<1x1x8x128xf32>,
      %c0_37 = arith.constant 0 : index
      %c2 = arith.constant 2 : index
      %c0_38 = arith.constant 0 : index
      %c0_39 = arith.constant 0 : index
      %82 = vector.load %arg5[%c0_37, %c2, %c0_38, %c0_39] : memref<1x4x8x128xf32, #tpu.memory_space<vmem>>, vector<1x1x8x128xf32>
      %83 = vector.shape_cast %82 : vector<1x1x8x128xf32> to vector<8x128xf32>
      %84 = arith.addf %83, %66 : vector<8x128xf32>
      %c0_40 = arith.constant 0 : index
      %c2_41 = arith.constant 2 : index
      %c0_42 = arith.constant 0 : index
      %c0_43 = arith.constant 0 : index
      %85 = vector.load %arg5[%c0_40, %c2_41, %c0_42, %c0_43] : memref<1x4x8x128xf32, #tpu.memory_space<vmem>>, vector<1x1x8x128xf32>
      %86 = vector.shape_cast %85 : vector<1x1x8x128xf32> to vector<8x128xf32>
      %87 = vector.shape_cast %84 : vector<8x128xf32> to vector<1x1x8x128xf32>
      tpu.vector_store %arg5[%c0_40, %c2_41, %c0_42, %c0_43], %87 {strides = array<i32>} : memref<1x4x8x128xf32, #tpu.memory_space<vmem>>, vector<1x1x8x128xf32>,
      %c0_44 = arith.constant 0 : index
      %c3 = arith.constant 3 : index
      %c0_45 = arith.constant 0 : index
      %c0_46 = arith.constant 0 : index
      %88 = vector.load %arg5[%c0_44, %c3, %c0_45, %c0_46] : memref<1x4x8x128xf32, #tpu.memory_space<vmem>>, vector<1x1x8x128xf32>
      %89 = vector.shape_cast %88 : vector<1x1x8x128xf32> to vector<8x128xf32>
      %90 = arith.addf %89, %69 : vector<8x128xf32>
      %c0_47 = arith.constant 0 : index
      %c3_48 = arith.constant 3 : index
      %c0_49 = arith.constant 0 : index
      %c0_50 = arith.constant 0 : index
      %91 = vector.load %arg5[%c0_47, %c3_48, %c0_49, %c0_50] : memref<1x4x8x128xf32, #tpu.memory_space<vmem>>, vector<1x1x8x128xf32>
      %92 = vector.shape_cast %91 : vector<1x1x8x128xf32> to vector<8x128xf32>
      %93 = vector.shape_cast %90 : vector<8x128xf32> to vector<1x1x8x128xf32>
      tpu.vector_store %arg5[%c0_47, %c3_48, %c0_49, %c0_50], %93 {strides = array<i32>} : memref<1x4x8x128xf32, #tpu.memory_space<vmem>>, vector<1x1x8x128xf32>,
    } else {
    }
    return
  }
  func.func @transform_0(%arg0: i32, %arg1: i32) -> (i32, i32) {
    %c1_i32 = arith.constant 1 : i32
    %0 = arith.muli %arg0, %c1_i32 : i32
    %1 = arith.addi %0, %arg1 : i32
    %c0_i32 = arith.constant 0 : i32
    %2 = arith.minsi %1, %c0_i32 : i32
    %c0_i32_0 = arith.constant 0 : i32
    %c0_i32_1 = arith.constant 0 : i32
    return %2, %c0_i32_0 : i32, i32
  }
  func.func @transform_1(%arg0: i32, %arg1: i32) -> (i32, i32) {
    %c1_i32 = arith.constant 1 : i32
    %0 = arith.muli %arg0, %c1_i32 : i32
    %1 = arith.addi %0, %arg1 : i32
    %c0_i32 = arith.constant 0 : i32
    %2 = arith.minsi %1, %c0_i32 : i32
    %c0_i32_0 = arith.constant 0 : i32
    %c0_i32_1 = arith.constant 0 : i32
    return %2, %c0_i32_0 : i32, i32
  }
  func.func @transform_2(%arg0: i32, %arg1: i32) -> (i32, i32) {
    %c1_i32 = arith.constant 1 : i32
    %0 = arith.muli %arg0, %c1_i32 : i32
    %1 = arith.addi %0, %arg1 : i32
    %c0_i32 = arith.constant 0 : i32
    %2 = arith.minsi %1, %c0_i32 : i32
    %c0_i32_0 = arith.constant 0 : i32
    %c0_i32_1 = arith.constant 0 : i32
    return %2, %c0_i32_0 : i32, i32
  }
  func.func @transform_3(%arg0: i32, %arg1: i32) -> (i32, i32, i32, i32) {
    %c0_i32 = arith.constant 0 : i32
    %c0_i32_0 = arith.constant 0 : i32
    %c0_i32_1 = arith.constant 0 : i32
    %c0_i32_2 = arith.constant 0 : i32
    return %arg0, %c0_i32, %c0_i32_0, %c0_i32_1 : i32, i32, i32, i32
  }
}

</mosaic_0001>

<bundles_post_ra>
// kernel: tpu_custom_call.1
= control target key start
LH: loop header
LB: loop body
LE: loop exit
PB: predicated region body
PF: predicated region fallthrough
CT: control target
= control target key end

     0   :  { %8 = vsyncpa [#allocation3], 0  ;;  %s620_s0 = inlined_call_operand.hbm [shape: f32[16,128], index: 0, kind: input, shape index: {}]   ;;  %s621_s1 = inlined_call_operand.hbm [shape: f32[16,128], index: 1, kind: input, shape index: {}]   ;;  %s622_s2 = inlined_call_operand.hbm [shape: f32[16,128], index: 2, kind: input, shape index: {}]   ;;  %s623_s3 = inlined_call_operand.hbm [shape: f32[1,4,8,128], index: 3, kind: output, shape index: {}]  }
   0x1   :  { %9 = vsyncpa [#allocation6], 0 }
   0x2   :  { %10 = vsyncpa [#allocation4], 0 }
   0x3   :  { %21 = vsyncadd [#allocation3], 256  ;;  %s534_s12 = smov [#allocation2]   ;;  %s440_s16 = scalar_lea.hbm %s620_s0, 256 }
   0x4   :  { %s26_s13 = sshll.u32 %s534_s12, 4  ;;  %p441_p0 = scmp.ne.s32.totalorder %s620_s0, %s440_s16  ;;  %s27_s13 = int_to_ptr.vmem [resolvable:$true] %s26_s13 }
   0x5   :  { %p444_p1 = scmp.lt.u32.totalorder %s440_s16, %s620_s0 }
   0x7   :  { %p446_p2 = pnand %p444_p1, %p441_p0 }
   0x9   :  { %449 = shalt.err (!%p446_p2)
}
   0xa   :  { %s450_s21 = scalar_lea.vmem %s27_s13, 256  ;;  %s454_s22 = scalar_lea.vmem %s27_s13, 512 }
   0xb   :  { %p451_p3 = scmp.ne.s32.totalorder %s27_s13, %s450_s21  ;;  %p455_p4 = scmp.lt.s32.totalorder %s27_s13, %s27_s13 }
   0xc   :  { %p456_p5 = scmp.lt.s32.totalorder %s454_s22, %s450_s21 }
   0xe   :  { %p457_p6 = por %p456_p5, %p455_p4 }
  0x10   :  { %p458_p7 = pnand %p457_p6, %p451_p3 }
  0x12   :  { %461 = shalt.err (!%p458_p7)
}
  0x13   :  { %s535_s23 = smov 128   ;;  %s536_s24 = smov 8  }
  0x14   :  { %32 = dma.hbm_to_vmem [thread:$0]  %s620_s0, 256, %s27_s13, [#allocation3], %s535_s23, %s535_s23, %s536_s24  }
  0x15   :  { %43 = vsyncadd [#allocation6], 256  ;;  %s537_s27 = smov [#allocation5]   ;;  %s462_s4 = scalar_lea.hbm %s621_s1, 256 }
  0x16   :  { %s48_s28 = sshll.u32 %s537_s27, 4  ;;  %p463_p8 = scmp.ne.s32.totalorder %s621_s1, %s462_s4  ;;  %s49_s28 = int_to_ptr.vmem [resolvable:$true] %s48_s28 }
  0x17   :  { %p466_p9 = scmp.lt.u32.totalorder %s462_s4, %s621_s1 }
  0x19   :  { %p468_p10 = pnand %p466_p9, %p463_p8 }
  0x1b   :  { %471 = shalt.err (!%p468_p10)
}
  0x1c   :  { %s472_s9 = scalar_lea.vmem %s49_s28, 256  ;;  %s476_s0 = scalar_lea.vmem %s49_s28, 512 }
  0x1d   :  { %p473_p11 = scmp.ne.s32.totalorder %s49_s28, %s472_s9  ;;  %p477_p12 = scmp.lt.s32.totalorder %s49_s28, %s49_s28 }
  0x1e   :  { %p478_p13 = scmp.lt.s32.totalorder %s476_s0, %s472_s9 }
  0x20   :  { %p479_p0 = por %p478_p13, %p477_p12 }
  0x22   :  { %p480_p1 = pnand %p479_p0, %p473_p11 }
  0x24   :  { %483 = shalt.err (!%p480_p1)
}
  0x25   :  { %54 = dma.hbm_to_vmem [thread:$0]  %s621_s1, 256, %s49_s28, [#allocation6], %s535_s23, %s535_s23, %s536_s24  }
  0x26   :  { %65 = vsyncadd [#allocation6], 256  ;;  %s538_s12 = smov [#allocation7]   ;;  %s484_s16 = scalar_lea.hbm %s622_s2, 256 }
  0x27   :  { %s70_s13 = sshll.u32 %s538_s12, 4  ;;  %p485_p2 = scmp.ne.s32.totalorder %s622_s2, %s484_s16  ;;  %s71_s13 = int_to_ptr.vmem [resolvable:$true] %s70_s13 }
  0x28   :  { %p488_p3 = scmp.lt.u32.totalorder %s484_s16, %s622_s2 }
  0x2a   :  { %p490_p4 = pnand %p488_p3, %p485_p2 }
  0x2c   :  { %493 = shalt.err (!%p490_p4)
}
  0x2d   :  { %s494_s21 = scalar_lea.vmem %s71_s13, 256  ;;  %s498_s1 = scalar_lea.vmem %s71_s13, 512 }
  0x2e   :  { %p495_p5 = scmp.ne.s32.totalorder %s71_s13, %s494_s21  ;;  %p499_p6 = scmp.lt.s32.totalorder %s71_s13, %s71_s13 }
  0x2f   :  { %p500_p7 = scmp.lt.s32.totalorder %s498_s1, %s494_s21 }
  0x31   :  { %p501_p8 = por %p500_p7, %p499_p6 }
  0x33   :  { %p502_p9 = pnand %p501_p8, %p495_p5 }
  0x35   :  { %505 = shalt.err (!%p502_p9)
}
  0x36   :  { %76 = dma.hbm_to_vmem [thread:$0]  %s622_s2, 256, %s71_s13, [#allocation6], %s535_s23, %s535_s23, %s536_s24  }
  0x37   :  { %528 = dma.done.wait [#allocation3], 512  }
  0x38   :  { %529 = vsyncadd [#allocation3], 4294966784 }
  0x39   :  { %530 = dma.done.wait [#allocation6], 1024  }
  0x3a   :  { %531 = vsyncadd [#allocation6], 4294966272  ;;  %v251_v0 = vld [vmem:[#allocation2] sm:$0xff]  ;;  %v252_v1 = vld [vmem:[#allocation2 + $0x8] sm:$0xff]  ;;  %s539_s2 = smov [#allocation8]  }
  0x3b   :  { %v255_v2 = vld [vmem:[#allocation7] sm:$0xff]  ;;  %v256_v3 = vld [vmem:[#allocation7 + $0x8] sm:$0xff]  ;;  %s402_s26 = sshll.u32 %s539_s2, 4  ;;  %s403_s26 = int_to_ptr.vmem [resolvable:$true] %s402_s26 }
  0x3c   :  { %v259_v4 = vld [vmem:[#allocation5] sm:$0xff]  ;;  %v260_v5 = vld [vmem:[#allocation5 + $0x8] sm:$0xff]  ;;  %v263_v6 = vmul.f32 %v255_v2, %v251_v0  ;;  %v264_v7 = vmul.f32 %v256_v3, %v252_v1  ;;  %s506_s27 = scalar_lea.vmem %s403_s26, 512  ;;  %p511_p11 = scmp.lt.s32.totalorder %s403_s26, %s403_s26 }
  0x3d   :  { %v378_v8 = vadd.f32 %v260_v5, %v259_v4  ;;  %vm346_vm0 = vcmp.gt.f32.partialorder %v259_v4, 0.5  ;;  %vm347_vm1 = vcmp.gt.f32.partialorder %v260_v5, 0.5  ;;  %p507_p10 = scmp.ne.s32.totalorder %s403_s26, %s506_s27  ;;  %p512_p12 = scmp.lt.s32.totalorder %s506_s27, %s506_s27 }
  0x3e   :  { %v290_v9 = vsub.f32 0.0, %v263_v6  ;;  %v291_v10 = vsub.f32 0.0, %v264_v7  ;;  %v318_v29 = vmax.f32 %v263_v6, 0.0  ;;  %v322_v30 = vmul.f32 %v263_v6, %v259_v4 }
  0x3f   :  { %396 = vst [vmem:[#allocation8 + $0x18] sm:$0xff] %v378_v8  ;;  %v319_v31 = vmax.f32 %v264_v7, 0.0  ;;  %v323_v32 = vmul.f32 %v264_v7, %v260_v5  ;;  %p513_p13 = por %p512_p12, %p511_p11 }
  0x40   :  { %v294_v11 = vmul.f32 1.442695, %v290_v9  ;;  %v296_v12 = vmul.f32 1.442695, %v291_v10  ;;  %v326_v34 = vsub.f32 %v318_v29, %v322_v30 }
  0x41   :  { %v327_v37 = vsub.f32 %v319_v31, %v323_v32  ;;  %p514_p0 = pnand %p513_p13, %p507_p10 }
  0x42   :  { %428 = vpow2.f32 %v294_v11 }
  0x43   :  { %430 = vpow2.f32 %v296_v12 }
  0x4c   :  { %v429_v13 = vpop.eup %428 }
  0x4d   :  { %v431_v14 = vpop.eup %430  ;;  %v302_v15 = vadd.f32 1.0, %v429_v13 }
  0x4e   :  { %v303_v16 = vadd.f32 1.0, %v431_v14 }
  0x4f   :  { %432 = vrcp.f32 %v302_v15 }
  0x50   :  { %434 = vrcp.f32 %v303_v16 }
  0x59   :  { %v433_v17 = vpop.eup %432 }
  0x5a   :  { %v435_v18 = vpop.eup %434  ;;  %v314_v19 = vsub.f32 1.0, %v433_v17  ;;  %v366_v20 = vmul.f32 %v433_v17, %v259_v4 }
  0x5b   :  { %v315_v21 = vsub.f32 1.0, %v435_v18  ;;  %v367_v22 = vmul.f32 %v435_v18, %v260_v5  ;;  %v374_v23 = vadd.f32 %v435_v18, %v433_v17 }
  0x5c   :  { %v330_v24 = vmax.f32 %v433_v17, %v314_v19  ;;  %v350_v33 = vsel %vm346_vm0, %v314_v19, %v433_v17 }
  0x5d   :  { %v331_v25 = vmax.f32 %v435_v18, %v315_v21  ;;  %v370_v26 = vadd.f32 %v367_v22, %v366_v20  ;;  %v375_v27 = vadd.f32 0.5, %v374_v23  ;;  %v351_v35 = vsel %vm347_vm1, %v315_v21, %v435_v18 }
  0x5e   :  { %436 = vlog2.f32 %v330_v24  ;;  %v354_v40 = vmul.f32 %v350_v33, %v350_v33  ;;  %v355_v42 = vmul.f32 %v351_v35, %v351_v35 }
  0x5f   :  { %438 = vlog2.f32 %v331_v25  ;;  %v376_v28 = vadd.f32 0.5, %v375_v27  ;;  %388 = vst [vmem:[#allocation8 + $0x8] sm:$0xff] %v370_v26 }
  0x61   :  { %392 = vst [vmem:[#allocation8 + $0x10] sm:$0xff] %v376_v28 }
  0x68   :  { %v437_v36 = vpop.eup %436 }
  0x69   :  { %v439_v38 = vpop.eup %438  ;;  %v335_v39 = vmul.f32 0.6931472, %v437_v36 }
  0x6a   :  { %v337_v41 = vmul.f32 0.6931472, %v439_v38 }
  0x6b   :  { %v342_v43 = vsub.f32 %v326_v34, %v335_v39 }
  0x6c   :  { %v343_v44 = vsub.f32 %v327_v37, %v337_v41 }
  0x6d   :  { %v358_v45 = vmul.f32 %v354_v40, %v342_v43 }
  0x6e   :  { %v359_v46 = vmul.f32 %v355_v42, %v343_v44 }
  0x70   :  { %v362_v47 = vadd.f32 %v359_v46, %v358_v45 }
  0x72   :  { %v363_v48 = vadd.f32 0.1732868, %v362_v47 }
  0x74   :  { %v364_v49 = vadd.f32 0.1732868, %v363_v48 }
  0x76   :  { %384 = vst [vmem:[#allocation8] sm:$0xff] %v364_v49 }
  0x77   :  { %517 = shalt.err (!%p514_p0)
}
  0x78   :  { %s518_s30 = scalar_lea.hbm %s623_s3, 512 }
  0x79   :  { %p519_p1 = scmp.ne.s32.totalorder %s623_s3, %s518_s30  ;;  %p522_p2 = scmp.lt.u32.totalorder %s518_s30, %s623_s3 }
  0x7b   :  { %p524_p3 = pnand %p522_p2, %p519_p1 }
  0x7d   :  { %527 = shalt.err (!%p524_p3)
}
  0x7e   :  { %408 = dma.vmem_to_hbm [thread:$0]  %s403_s26, 512, %s623_s3, [#allocation4], %s535_s23, %s535_s23, %s536_s24  }
  0x7f   :  { %532 = dma.done.wait [#allocation4], 512  }
  0x80   :  { %533 = vsyncadd [#allocation4], 4294966784 }
  0x81   :  { %412 = vsyncpa [#allocation3], 1 }
  0x82   :  { %413 = vsyncpa [#allocation6], 1 }
  0x83   :  { %414 = vsyncpa [#allocation4], 1 }

</bundles_post_ra>
